<compile_context>
chip_gen: v7x
topology: tpu7x:2x2x1
jax: 0.10.0
libtpu: 0.0.40
codegen_flags: <defaults>
</compile_context>

<pallas_src>
import math

import jax
import jax.numpy as jnp
from jax import lax
from jax.experimental import pallas as pl
from jax.experimental.pallas import tpu as pltpu

_VMEM_LIMIT = 32 * 1024 * 1024  # explicit scoped-VMEM budget (safe on v5e/v6e/v7x)


# ----------------------------------------------------------------------------
# Head-major linear projection:
#   x: (N, Din) f32, w: (S, Din, d_k) bf16, b: (S, 1, d_k) f32
#   out[s, n, :] = x[n, :] @ w[s] + b[s]           -> (S, N, d_k) bf16
# S = h for a single projection or 3h for the fused QKV projection.  The x row
# tile is reused across all S inner steps (same block index), weights cycle.
# ----------------------------------------------------------------------------
def _head_proj_kernel(x_ref, w_ref, b_ref, o_ref):
    y = jnp.dot(x_ref[...].astype(jnp.bfloat16), w_ref[...],
                preferred_element_type=jnp.float32) + b_ref[...]
    o_ref[...] = y.astype(o_ref.dtype)


def head_projection(x, w_heads, b_heads, *, tm=512):
    n, din = x.shape
    s, _, dk = w_heads.shape
    tm = min(tm, n)
    return pl.pallas_call(
        _head_proj_kernel,
        out_shape=jax.ShapeDtypeStruct((s, n, dk), jnp.bfloat16),
        grid=(pl.cdiv(n, tm), s),
        in_specs=[
            pl.BlockSpec((tm, din), lambda i, j: (i, 0)),
            pl.BlockSpec((None, din, dk), lambda i, j: (j, 0, 0)),
            pl.BlockSpec((None, 1, dk), lambda i, j: (j, 0, 0)),
        ],
        out_specs=pl.BlockSpec((None, tm, dk), lambda i, j: (j, i, 0)),
        compiler_params=pltpu.CompilerParams(
            dimension_semantics=("parallel", "parallel"),
            vmem_limit_bytes=_VMEM_LIMIT,
        ),
    )(x, w_heads, b_heads)


# ----------------------------------------------------------------------------
# Output projection with the head axis as an accumulation ("arbitrary") grid axis:
#   ctx: (h, N, d_k) bf16, w: (h, d_k, Dout) bf16, b: (1, Dout) f32
#   out[n, :] = sum_h ctx[h, n, :] @ w[h] + b      -> (N, Dout) f32
# The head merge happens on the MXU -- no (B,T,h,d_k) -> (B,T,D) transpose.
# ----------------------------------------------------------------------------
def _out_proj_kernel(x_ref, w_ref, b_ref, o_ref, acc_ref):
    @pl.when(pl.program_id(1) == 0)
    def _():
        acc_ref[...] = jnp.zeros_like(acc_ref)

    acc_ref[...] += jnp.dot(x_ref[...], w_ref[...],
                            preferred_element_type=jnp.float32)

    @pl.when(pl.program_id(1) == pl.num_programs(1) - 1)
    def _():
        o_ref[...] = (acc_ref[...] + b_ref[...]).astype(o_ref.dtype)


def out_projection(ctx, w_heads, b, *, tm=512):
    h, n, dk = ctx.shape
    dout = w_heads.shape[2]
    tm = min(tm, n)
    return pl.pallas_call(
        _out_proj_kernel,
        out_shape=jax.ShapeDtypeStruct((n, dout), jnp.float32),
        grid=(pl.cdiv(n, tm), h),
        in_specs=[
            pl.BlockSpec((None, tm, dk), lambda i, j: (j, i, 0)),
            pl.BlockSpec((None, dk, dout), lambda i, j: (j, 0, 0)),
            pl.BlockSpec((1, dout), lambda i, j: (0, 0)),
        ],
        out_specs=pl.BlockSpec((tm, dout), lambda i, j: (i, 0)),
        scratch_shapes=[pltpu.VMEM((tm, dout), jnp.float32)],
        compiler_params=pltpu.CompilerParams(
            dimension_semantics=("parallel", "arbitrary"),
            vmem_limit_bytes=_VMEM_LIMIT,
        ),
    )(ctx, w_heads, b)


# ----------------------------------------------------------------------------
# Fused rel-pos attention: one (batch, head) pair per grid step.
# Blocks: q/k/v (T, d_k), p (P_pad, d_k), pos biases (1, d_k), mask (T, T).
# ----------------------------------------------------------------------------
def _relpos_attn_kernel(q_ref, k_ref, v_ref, p_ref, u_ref, vb_ref, mask_ref, o_ref):
    t, d_k = q_ref.shape
    p_pad = p_ref.shape[0]
    scale = 1.0 / math.sqrt(d_k)

    q = q_ref[...]                       # (T, dk) bf16
    qu = q + u_ref[...]                  # + pos_bias_u (in-kernel, VPU filler under MXU)
    qv = q + vb_ref[...]                 # + pos_bias_v

    # matrix_ac = (q + u) @ k^T ; matrix_bd_full = (q + v) @ p^T   (contract d_k)
    ac = lax.dot_general(qu, k_ref[...], (((1,), (1,)), ((), ())),
                         preferred_element_type=jnp.float32)          # (T, T)
    bd_full = lax.dot_general(qv, p_ref[...], (((1,), (1,)), ((), ())),
                              preferred_element_type=jnp.float32)     # (T, P_pad)

    # Non-legacy rel_shift via one static strided XLU roll with a lane-aligned window:
    #   rolled[t, j] = bd_full[t, (j + T - 1 - t) mod P_pad] = bd_full[t, T - 1 - t + j]
    # (indices stay in [0, 2T-2] subset of [0, P_pad) -> padding is never read).
    rolled = pltpu.roll(bd_full, shift=(-(t - 1)) % p_pad, axis=1,
                        stride=1, stride_axis=0)
    bd = rolled[:, :t]                                                # (T, T), lane 0 start

    # TODO(synk): flash-style q/kv tiling with online softmax + causal tile-skip for
    #             long sequences (T >= ~512); whole-row softmax is fine at these sizes.
    scores = (ac + bd) * scale + mask_ref[...]                        # f32
    m = jnp.max(scores, axis=-1, keepdims=True)
    e = jnp.exp(scores - m)
    attn = e * pl.reciprocal(jnp.sum(e, axis=-1, keepdims=True), approx=True)
    # TODO(synk): the torch module stores `self.attn` as a side effect; not reproduced.

    ctx = jnp.dot(attn.astype(jnp.bfloat16), v_ref[...],
                  preferred_element_type=jnp.float32)                 # (T, dk)
    o_ref[...] = ctx.astype(o_ref.dtype)


def relpos_attention(q_arr, k_arr, v_arr, slots, p, bias_u, bias_v, mask,
                     *, h, bsz, t, d_k):
    """q/k/v arrays are head-major (slots, B, T, d_k); `slots` gives each one's
    slot offset (all three may alias the same fused (3h, B, T, d_k) buffer)."""
    p_pad = p.shape[2]
    qo, ko, vo = slots
    p_batch = (lambda bi: bi) if p.shape[1] == bsz else (lambda bi: 0)
    m_batch = (lambda bi: bi) if mask.shape[0] == bsz else (lambda bi: 0)
    return pl.pallas_call(
        _relpos_attn_kernel,
        out_shape=jax.ShapeDtypeStruct((h, bsz, t, d_k), jnp.bfloat16),
        grid=(bsz, h),
        in_specs=[
            pl.BlockSpec((None, None, t, d_k), lambda bi, hd: (qo + hd, bi, 0, 0)),
            pl.BlockSpec((None, None, t, d_k), lambda bi, hd: (ko + hd, bi, 0, 0)),
            pl.BlockSpec((None, None, t, d_k), lambda bi, hd: (vo + hd, bi, 0, 0)),
            pl.BlockSpec((None, None, p_pad, d_k), lambda bi, hd: (hd, p_batch(bi), 0, 0)),
            pl.BlockSpec((None, 1, d_k), lambda bi, hd: (hd, 0, 0)),
            pl.BlockSpec((None, 1, d_k), lambda bi, hd: (hd, 0, 0)),
            pl.BlockSpec((None, None, t, t), lambda bi, hd: (m_batch(bi), 0, 0, 0)),
        ],
        out_specs=pl.BlockSpec((None, None, t, d_k), lambda bi, hd: (hd, bi, 0, 0)),
        compiler_params=pltpu.CompilerParams(
            dimension_semantics=("parallel", "parallel"),
            vmem_limit_bytes=_VMEM_LIMIT,
        ),
    )(q_arr, k_arr, v_arr, p, bias_u, bias_v, mask)


# ----------------------------------------------------------------------------
# Full forward — head-major layout end-to-end, no XLA split/merge transposes.
# ----------------------------------------------------------------------------
def onnx_relpos_mha_forward(params, query, key, value, pos_emb, mask):
    bsz, t, d = query.shape
    h, d_k = params["h"], params["d_k"]
    assert d == h * d_k
    p_len = pos_emb.shape[1]
    assert p_len == 2 * t - 1, "non-legacy rel_shift assumes pos_emb length = 2T - 1"
    # TODO(synk): only the is_legacy=False (rel_shift) path is implemented.
    f32 = jnp.float32

    def head_w(w):   # torch (Dout, Din) -> head-major (h, Din, d_k), bf16 MXU operand
        return jnp.transpose(w.T.reshape(d, h, d_k), (1, 0, 2)).astype(jnp.bfloat16)

    def head_b(bias):
        return bias.reshape(h, 1, d_k).astype(f32)

    if (query is key) and (key is value):
        # Self-attention (the ESPnet case): one fused QKV projection, x read once.
        w_qkv = jnp.concatenate([head_w(params["linear_q_w"]),
                                 head_w(params["linear_k_w"]),
                                 head_w(params["linear_v_w"])], axis=0)   # (3h, D, dk)
        b_qkv = jnp.concatenate([head_b(params["linear_q_b"]),
                                 head_b(params["linear_k_b"]),
                                 head_b(params["linear_v_b"])], axis=0)   # (3h, 1, dk)
        qkv = head_projection(query.reshape(bsz * t, d), w_qkv, b_qkv)
        qkv = qkv.reshape(3 * h, bsz, t, d_k)
        q_arr = k_arr = v_arr = qkv          # same buffer, different BlockSpec slots
        slots = (0, h, 2 * h)
    else:
        def proj(x, name):
            y = head_projection(x.reshape(bsz * t, d),
                                head_w(params[name + "_w"]),
                                head_b(params[name + "_b"]))
            return y.reshape(h, bsz, t, d_k)
        q_arr = proj(query, "linear_q")
        k_arr = proj(key, "linear_k")
        v_arr = proj(value, "linear_v")
        slots = (0, 0, 0)

    # Positional projection: pad P -> lane-aligned P_pad *before* projecting so the
    # (h, Bp, P_pad, d_k) intermediate is written once, already padded.  Padded rows
    # are never read by the rel_shift window (indices stay < 2T-1 <= P_pad).
    bp = pos_emb.shape[0]
    p_pad_len = max(128, ((p_len + 127) // 128) * 128)
    pos_padded = jnp.pad(pos_emb, ((0, 0), (0, p_pad_len - p_len), (0, 0)))
    p = head_projection(pos_padded.reshape(bp * p_pad_len, d),
                        head_w(params["linear_pos_w"]),
                        head_b(params["linear_pos_b"]))
    p = p.reshape(h, bp, p_pad_len, d_k)

    bias_u = params["pos_bias_u"].reshape(h, 1, d_k).astype(jnp.bfloat16)
    bias_v = params["pos_bias_v"].reshape(h, 1, d_k).astype(jnp.bfloat16)

    if mask is None:
        mask = jnp.zeros((1, 1, t, t), f32)
    mask = mask.astype(f32)
    # TODO(synk): for pure padding/causal masks this dense (B,1,T,T) tensor could be
    #             replaced by an iota/length-generated mask inside the kernel.

    ctx = relpos_attention(q_arr, k_arr, v_arr, slots, p, bias_u, bias_v, mask,
                           h=h, bsz=bsz, t=t, d_k=d_k)              # (h, B, T, dk) bf16

    w_out = params["linear_out_w"].T.reshape(h, d_k, d).astype(jnp.bfloat16)
    b_out = params["linear_out_b"].reshape(1, d).astype(f32)
    out = out_projection(ctx.reshape(h, bsz * t, d_k), w_out, b_out)  # (B*T, D) f32
    return out.reshape(bsz, t, d)


# ----------------------------------------------------------------------------
# Pure-JAX f32 reference (mirrors the torch code incl. the pad/view rel_shift trick)
# ----------------------------------------------------------------------------
def reference_forward(params, query, key, value, pos_emb, mask):
    h, dk = params["h"], params["d_k"]
    d = h * dk

    def lin(x, name):
        return x @ params[name + "_w"].T + params[name + "_b"]

    def split(x):
        return x.reshape(x.shape[0], x.shape[1], h, dk).transpose(0, 2, 1, 3)

    q = split(lin(query, "linear_q"))
    k = split(lin(key, "linear_k"))
    v = split(lin(value, "linear_v"))
    p = split(lin(pos_emb, "linear_pos"))
    bu = params["pos_bias_u"][None, :, None, :]
    bv = params["pos_bias_v"][None, :, None, :]
    ac = jnp.einsum("bhqd,bhkd->bhqk", q + bu, k)
    bd = jnp.einsum("bhqd,bhpd->bhqp", q + bv, p)
    b_, h_, t_, p_ = bd.shape
    zero = jnp.zeros((b_, h_, t_, 1), bd.dtype)
    padded = jnp.concatenate([zero, bd], axis=-1).reshape(b_, h_, p_ + 1, t_)
    bd = padded[:, :, 1:].reshape(b_, h_, t_, p_)[:, :, :, : p_ // 2 + 1]
    scores = (ac + bd) / math.sqrt(dk)
    if mask is not None:
        scores = scores + mask
    attn = jax.nn.softmax(scores, axis=-1)
    ctx = jnp.einsum("bhqk,bhkd->bhqd", attn, v)
    ctx = ctx.transpose(0, 2, 1, 3).reshape(b_, t_, d)
    return ctx @ params["linear_out_w"].T + params["linear_out_b"]


if __name__ == "__main__":
    B, T, h, dk = 2, 16, 4, 64
    D = h * dk
    P = 2 * T - 1

    root = jax.random.PRNGKey(0)
    ks = jax.random.split(root, 16)

    def init(k, shape, scale=0.05):
        return (scale * jax.random.normal(k, shape)).astype(jnp.float32)

    params = {
        "h": h, "d_k": dk,
        "linear_q_w": init(ks[0], (D, D)), "linear_q_b": init(ks[1], (D,)),
        "linear_k_w": init(ks[2], (D, D)), "linear_k_b": init(ks[3], (D,)),
        "linear_v_w": init(ks[4], (D, D)), "linear_v_b": init(ks[5], (D,)),
        # ESPnet's linear_pos is nn.Linear(n_feat, n_feat, bias=False) -> zero bias
        "linear_pos_w": init(ks[6], (D, D)),
        "linear_pos_b": jnp.zeros((D,), jnp.float32),
        "linear_out_w": init(ks[7], (D, D)), "linear_out_b": init(ks[8], (D,)),
        "pos_bias_u": init(ks[9], (h, dk)), "pos_bias_v": init(ks[10], (h, dk)),
    }

    x = init(ks[11], (B, T, D), 1.0)
    pos_emb = init(ks[12], (B, P, D), 1.0)
    key_in = init(ks[13], (B, T, D), 1.0)
    value_in = init(ks[14], (B, T, D), 1.0)

    # additive causal mask, broadcast over heads (torch-style: scores = scores + mask)
    qi = jnp.arange(T)[:, None]
    kj = jnp.arange(T)[None, :]
    causal = jnp.where(kj <= qi, 0.0, -1e9).astype(jnp.float32)
    mask = jnp.broadcast_to(causal, (B, 1, T, T))

    # 1) Self-attention (query is key is value) -> fused QKV projection path.
    out = jax.block_until_ready(onnx_relpos_mha_forward(params, x, x, x, pos_emb, mask))
    ref = reference_forward(params, x, x, x, pos_emb, mask)
    assert out.shape == (B, T, D)
    err = float(jnp.max(jnp.abs(out - ref)))
    assert jnp.allclose(out, ref, atol=3e-2, rtol=3e-2), err

    # 2) Distinct query / key / value -> separate projection path.
    out2 = jax.block_until_ready(
        onnx_relpos_mha_forward(params, x, key_in, value_in, pos_emb, mask))
    ref2 = reference_forward(params, x, key_in, value_in, pos_emb, mask)
    err2 = float(jnp.max(jnp.abs(out2 - ref2)))
    assert jnp.allclose(out2, ref2, atol=3e-2, rtol=3e-2), err2

    print("KERNEL_OK")
</pallas_src>

<mosaic_0001>
module attributes {stable_mosaic.version = 11 : i64} {
  func.func @_head_proj_kernel(%arg0: i32, %arg1: i32, %arg2: memref<32x256xf32, #tpu.memory_space<vmem>>, %arg3: memref<1x256x64xbf16, #tpu.memory_space<vmem>>, %arg4: memref<1x1x64xf32, #tpu.memory_space<vmem>>, %arg5: memref<1x32x64xbf16, #tpu.memory_space<vmem>>) attributes {dimension_semantics = [#tpu.dimension_semantics<parallel>, #tpu.dimension_semantics<parallel>], iteration_bounds = array<i64: 1, 12>, scalar_prefetch = 0 : i64, scratch_operands = 0 : i64, tpu.core_type = #tpu.core_type<tc>, window_params = [{transform_indices = @transform_0, window_bounds = array<i64: 32, 256>}, {transform_indices = @transform_1, window_bounds = array<i64: 1, 256, 64>}, {transform_indices = @transform_2, window_bounds = array<i64: 1, 1, 64>}, {transform_indices = @transform_3, window_bounds = array<i64: 1, 32, 64>}]} {
    %c0 = arith.constant 0 : index
    %c0_0 = arith.constant 0 : index
    %0 = vector.load %arg2[%c0, %c0_0] : memref<32x256xf32, #tpu.memory_space<vmem>>, vector<32x256xf32>
    %1 = arith.truncf %0 : vector<32x256xf32> to vector<32x256xbf16>
    %c0_1 = arith.constant 0 : index
    %c0_2 = arith.constant 0 : index
    %c0_3 = arith.constant 0 : index
    %2 = vector.load %arg3[%c0_1, %c0_2, %c0_3] : memref<1x256x64xbf16, #tpu.memory_space<vmem>>, vector<1x256x64xbf16>
    %3 = vector.shape_cast %2 : vector<1x256x64xbf16> to vector<256x64xbf16>
    %cst = arith.constant dense<0.000000e+00> : vector<32x64xf32>
    %4 = tpu.matmul %1, %3, %cst {dimension_numbers = #tpu.dot_dimension_numbers<[1], [0], [0], [1], [0, 0, 1, 1], [], []>} : vector<32x256xbf16>, vector<256x64xbf16>, vector<32x64xf32> -> vector<32x64xf32>
    %c0_4 = arith.constant 0 : index
    %c0_5 = arith.constant 0 : index
    %c0_6 = arith.constant 0 : index
    %5 = vector.load %arg4[%c0_4, %c0_5, %c0_6] : memref<1x1x64xf32, #tpu.memory_space<vmem>>, vector<1x1x64xf32>
    %6 = vector.shape_cast %5 : vector<1x1x64xf32> to vector<1x64xf32>
    %7 = vector.broadcast %6 : vector<1x64xf32> to vector<32x64xf32>
    %8 = arith.addf %4, %7 : vector<32x64xf32>
    %9 = arith.truncf %8 : vector<32x64xf32> to vector<32x64xbf16>
    %c0_7 = arith.constant 0 : index
    %c0_8 = arith.constant 0 : index
    %c0_9 = arith.constant 0 : index
    %10 = vector.load %arg5[%c0_7, %c0_8, %c0_9] : memref<1x32x64xbf16, #tpu.memory_space<vmem>>, vector<1x32x64xbf16>
    %11 = vector.shape_cast %10 : vector<1x32x64xbf16> to vector<32x64xbf16>
    %12 = vector.shape_cast %9 : vector<32x64xbf16> to vector<1x32x64xbf16>
    tpu.vector_store %arg5[%c0_7, %c0_8, %c0_9], %12 {strides = array<i32>} : memref<1x32x64xbf16, #tpu.memory_space<vmem>>, vector<1x32x64xbf16>,
    return
  }
  func.func @transform_0(%arg0: i32, %arg1: i32) -> (i32, i32) {
    %c0_i32 = arith.constant 0 : i32
    %c0_i32_0 = arith.constant 0 : i32
    return %arg0, %c0_i32 : i32, i32
  }
  func.func @transform_1(%arg0: i32, %arg1: i32) -> (i32, i32, i32) {
    %c0_i32 = arith.constant 0 : i32
    %c0_i32_0 = arith.constant 0 : i32
    %c0_i32_1 = arith.constant 0 : i32
    return %arg1, %c0_i32, %c0_i32_0 : i32, i32, i32
  }
  func.func @transform_2(%arg0: i32, %arg1: i32) -> (i32, i32, i32) {
    %c0_i32 = arith.constant 0 : i32
    %c0_i32_0 = arith.constant 0 : i32
    %c0_i32_1 = arith.constant 0 : i32
    return %arg1, %c0_i32, %c0_i32_0 : i32, i32, i32
  }
  func.func @transform_3(%arg0: i32, %arg1: i32) -> (i32, i32, i32) {
    %c0_i32 = arith.constant 0 : i32
    %c0_i32_0 = arith.constant 0 : i32
    return %arg1, %arg0, %c0_i32 : i32, i32, i32
  }
}

</mosaic_0001>

<bundles_post_ra>
// kernel: tpu_custom_call.1
= control target key start
LH: loop header
LB: loop body
LE: loop exit
PB: predicated region body
PF: predicated region fallthrough
CT: control target
= control target key end

     0   :  { %8 = vsyncpa [#allocation3], 0  ;;  %s983_s0 = inlined_call_operand.vmem [shape: f32[32,256], index: 0, kind: input, shape index: {}]   ;;  %s984_s1 = inlined_call_operand.vmem [shape: bf16[12,256,64], index: 1, kind: input, shape index: {}]   ;;  %s985_s2 = inlined_call_operand.vmem [shape: f32[12,1,64], index: 2, kind: input, shape index: {}]   ;;  %s986_s3 = inlined_call_operand.hbm [shape: bf16[12,32,64], index: 3, kind: output, shape index: {}]  }
   0x1   :  { %10 = vsyncpa [#allocation3 + $0x1], 0  ;;  %s815_s12 = smov 0   ;;  %s817_s13 = smov 0  }
   0x2   :  { %s819_s14 = smov 0   ;;  %s821_s15 = smov 0  }
   0x3   :  { %s823_s16 = smov 0   ;;  %s825_s17 = smov 0  }
   0x4 LB: > { %s554_s18 = sadd.s32 4294967295, %s790_s17   ;;  %s555_s19 = sadd.s32 4294967294, %s790_s17   ;;  %s790_s17 = sphi %s825_s17, %s16_s17   ;;  %s786_s16 = sphi %s823_s16, %s993_s16   ;;  %s782_s15 = sphi %s821_s15, %s992_s15   ;;  %s778_s14 = sphi %s819_s14, %s991_s14   ;;  %s774_s13 = sphi %s817_s13, %s990_s13   ;;  %s770_s12 = sphi %s815_s12, %s989_s12  }
   0x5   : > { %s25_s20 = sadd.s32 1, %s786_s16  ;;  %s115_s21 = sadd.s32 1, %s778_s14 }
   0x6   : > { %p26_p0 = scmp.ge.s32.totalorder %s25_s20, 12  ;;  %p125_p1 = scmp.ne.s32.totalorder %s778_s14, %s774_s13 }
   0x7   : > { %p126_p2 = scmp.eq.s32.totalorder %s554_s18, 11  ;;  %p131_p3 = scmp.ne.s32.totalorder %s774_s13, %s770_s12 }
   0x8   : > { %s995_s20 = smov (%p26_p0, %s25_s20), 0  ;;  %p132_p5 = scmp.eq.s32.totalorder %s555_s19, 11 }
   0x9   : > { %p855_p4 = por %p126_p2, %p125_p1  ;;  %s110_s23 = ssub.s32 %s786_s16, %s995_s20 }
   0xa   : > { %p559_p6 = scmp.ge.s32.totalorder %s790_s17, 1  ;;  %p113_p7 = scmp.eq.s32.totalorder %s110_s23, 0 }
   0xb   : > { %p862_p8 = por %p132_p5, %p131_p3  ;;  %p174_p9 = scmp.lt.s32.totalorder %s790_s17, 13 }
   0xc   : > { %s868_s25 = scalar_select %p113_p7, %s778_s14, %s115_s21  }
   0xd   : > { %p175_p10 = pnand %p559_p6, %p174_p9 }
   0xe   : > { %p214_p11 = scmp.lt.s32.totalorder (!%p175_p10), %s782_s15, 11  ;;  %v225_v0 = vld [vmem:[%s983_s0 + $0x8] sm:$0xff] (!%p175_p10)  ;;  %v227_v1 = vld [vmem:[%s983_s0 + $0x18] sm:$0xff] (!%p175_p10)  ;;  %v224_v21 = vld [vmem:[%s983_s0] sm:$0xff] (!%p175_p10)  ;;  %s204_s30 = sand.u32 (!%p175_p10), 1, %s774_s13   ;;  %vm436_vm0 = vcmask (!%p175_p10), 519168  }
   0xf   : > { %178 = sbr.rel (%p175_p10) target bundleno = 295 (0x127), region = 32  ;;  %v229_v2 = vld [vmem:[%s983_s0 + $0x28] sm:$0xff] (!%p175_p10)  ;;  %v233_v3 = vpack.c.bf16 (!%p175_p10), %v227_v1, %v225_v0  ;;  %v231_v4 = vld [vmem:[%s983_s0 + $0x38] sm:$0xff] (!%p175_p10)  ;;  %v226_v22 = vld [vmem:[%s983_s0 + $0x10] sm:$0xff] (!%p175_p10)  ;;  %s560_s4 = sshll.u32 (!%p175_p10), %s204_s30, 4 }
  0x10   : > { %v235_v5 = vpack.c.bf16 (!%p175_p10), %v231_v4, %v229_v2  ;;  %v228_v24 = vld [vmem:[%s983_s0 + $0x20] sm:$0xff] (!%p175_p10)  ;;  %v230_v25 = vld [vmem:[%s983_s0 + $0x30] sm:$0xff] (!%p175_p10)  ;;  %v232_v26 = vpack.c.bf16 (!%p175_p10), %v226_v22, %v224_v21  ;;  %s594_s9 = sshll.u32 (!%p175_p10), %s782_s15, 8  ;;  %s206_s10 = scalar_lea.vmem (!%p175_p10), [#allocation2], %s560_s4 }
  0x11   : > { %403 = vmatprep.mubr.bf16.mxu0 (!%p175_p10), %v233_v3  ;;  %v234_v27 = vpack.c.bf16 (!%p175_p10), %v230_v25, %v228_v24  ;;  %s931_s19 = scalar_lea.hbm (!%p175_p10), %s986_s3, %s594_s9  ;;  %s792_s23 = smov (!%p175_p10), [#allocation2]  }
  0x12   : > { %411 = vmatprep.mubr.bf16.mxu1 (!%p175_p10), %v235_v5  ;;  %s716_s26 = sshll.u32 (!%p175_p10), %s792_s23, 4  ;;  %s717_s26 = int_to_ptr.vmem [resolvable:$false] %s716_s26 }
  0x13   : > { %s718_s27 = scalar_lea.vmem (!%p175_p10), %s717_s26, 512 }
  0x16   : > { %s884_s7 = scalar_select %p214_p11, %s782_s15, 11 }
  0x17   : > { %s937_s15 = scalar_lea.sflag [#allocation3], %s204_s30 }
  0x18   : > { %s589_s8 = sshll.u32 %s884_s7, 7 }
  0x19   : > { %s890_s11 = scalar_lea.vmem %s984_s1, %s589_s8  ;;  %s221_s8 = scalar_lea.vmem %s985_s2, %s884_s7 }
  0x1a   : > { %v696_v6 = vld [vmem:[%s890_s11 + $0x40] sm:$0xff]   ;;  %v698_v8 = vld [vmem:[%s890_s11 + $0x48] sm:$0xff]   ;;  %v700_v10 = vld [vmem:[%s890_s11 + $0x50] sm:$0xff]   ;;  %s457_s7 = sshll.u32 %s206_s10, 4  ;;  %s933_s7 = int_to_ptr.vmem [resolvable:$true] %s457_s7 }
  0x1b   : > { %v697_v7 = vld [vmem:[%s890_s11] sm:$0xff]   ;;  %595 = vmatprep.subr.bf16.mxu0 %v696_v6  ;;  %623 = vmatprep.subr.bf16.mxu1 %v696_v6  ;;  %v699_v9 = vld [vmem:[%s890_s11 + $0x8] sm:$0xff]   ;;  %v701_v11 = vld [vmem:[%s890_s11 + $0x10] sm:$0xff]   ;;  %s712_s21 = scalar_lea.vmem %s933_s7, 256  ;;  %p719_p1 = scmp.lt.s32.totalorder %s933_s7, %s717_s26 }
  0x1c   : > { %596 = vmatpush3.bf16.msra.mxu0 %v697_v7  ;;  %631 = vmatpush3.bf16.msra.mxu1 %v697_v7  ;;  %v702_v12 = vld [vmem:[%s890_s11 + $0x58] sm:$0xff]   ;;  %v704_v14 = vld [vmem:[%s890_s11 + $0x60] sm:$0xff]   ;;  %v706_v16 = vld [vmem:[%s890_s11 + $0x68] sm:$0xff]   ;;  %p713_p12 = scmp.ne.s32.totalorder %s933_s7, %s712_s21  ;;  %p720_p2 = scmp.lt.s32.totalorder %s718_s27, %s712_s21 }
  0x1d   : > { %597 = vmatprep.subr.bf16.mxu0 %v698_v8  ;;  %624 = vmatprep.subr.bf16.mxu1 %v698_v8  ;;  %v703_v13 = vld [vmem:[%s890_s11 + $0x18] sm:$0xff]   ;;  %v705_v15 = vld [vmem:[%s890_s11 + $0x20] sm:$0xff]   ;;  %v707_v17 = vld [vmem:[%s890_s11 + $0x28] sm:$0xff]  }
  0x1e   : > { %v708_v18 = vld [vmem:[%s890_s11 + $0x70] sm:$0xff]   ;;  %v710_v20 = vld [vmem:[%s890_s11 + $0x78] sm:$0xff]   ;;  %v563_v30 = vld [vmem:[%s221_s8] ss:$0 sm:$0xff]  ;;  %p714_p13 = pnand %p713_p12, %p855_p4  ;;  %p721_p3 = por %p720_p2, %p719_p1 }
  0x1f   : > { %v709_v19 = vld [vmem:[%s890_s11 + $0x30] sm:$0xff]   ;;  %v711_v23 = vld [vmem:[%s890_s11 + $0x38] sm:$0xff]  }
  0x20   : > { %598 = vmatpush3.bf16.msra.mxu0 %v699_v9  ;;  %632 = vmatpush3.bf16.msra.mxu1 %v699_v9  ;;  %p715_p0 = pneg %p714_p13 }
  0x21   : > { %599 = vmatprep.subr.bf16.mxu0 %v700_v10  ;;  %625 = vmatprep.subr.bf16.mxu1 %v700_v10 }
  0x22   : > { %p722_p5 = pnand %p721_p3, %p715_p0 }
  0x24   : > { %600 = vmatpush3.bf16.msra.mxu0 %v701_v11  ;;  %633 = vmatpush3.bf16.msra.mxu1 %v701_v11 }
  0x25   : > { %601 = vmatprep.subr.bf16.mxu0 %v702_v12  ;;  %626 = vmatprep.subr.bf16.mxu1 %v702_v12 }
  0x28   : > { %602 = vmatpush3.bf16.msra.mxu0 %v703_v13  ;;  %634 = vmatpush3.bf16.msra.mxu1 %v703_v13 }
  0x29   : > { %603 = vmatprep.subr.bf16.mxu0 %v704_v14  ;;  %627 = vmatprep.subr.bf16.mxu1 %v704_v14 }
  0x2c   : > { %604 = vmatpush3.bf16.msra.mxu0 %v705_v15  ;;  %635 = vmatpush3.bf16.msra.mxu1 %v705_v15 }
  0x2d   : > { %605 = vmatprep.subr.bf16.mxu0 %v706_v16  ;;  %628 = vmatprep.subr.bf16.mxu1 %v706_v16 }
  0x30   : > { %606 = vmatpush3.bf16.msra.mxu0 %v707_v17  ;;  %636 = vmatpush3.bf16.msra.mxu1 %v707_v17 }
  0x31   : > { %607 = vmatprep.subr.bf16.mxu0 %v708_v18  ;;  %629 = vmatprep.subr.bf16.mxu1 %v708_v18 }
  0x34   : > { %608 = vmatpush3.bf16.msra.mxu0 %v709_v19  ;;  %637 = vmatpush3.bf16.msra.mxu1 %v709_v19 }
  0x35   : > { %609 = vmatprep.subr.bf16.mxu0 %v710_v20  ;;  %630 = vmatprep.subr.bf16.mxu1 %v710_v20 }
  0x38   : > { %610 = vmatpush3.bf16.msra.mxu0 %v711_v23  ;;  %638 = vmatpush3.bf16.msra.mxu1 %v711_v23 }
  0x3b   : > { %404 = vmatmul.mubr.bf16.vlgmr.msra.gmra.mrb[0].mxu0 %v232_v26  ;;  %412 = vmatmul.mubr.bf16.vlgmr.msra.gmra.mrb[0].mxu1 %v234_v27 }
 0x10e   : > { %v611_v28 = vpop.f32.mrb[0].mxu0  ;;  %v617_v29 = vpop.f32.mrb[0].mxu1 }
 0x10f   : > { %v612_v31 = vpop.f32.mrb[1].mxu0  ;;  %v618_v32 = vpop.f32.mrb[1].mxu1 }
 0x110   : > { %v613_v33 = vadd.f32 %v612_v31, %v611_v28  ;;  %v619_v34 = vadd.f32 %v618_v32, %v617_v29  ;;  %v614_v35 = vpop.f32.mrb[2].mxu0  ;;  %v620_v36 = vpop.f32.mrb[2].mxu1 }
 0x111   : > { %v615_v37 = vpop.f32.mrb[3].mxu0  ;;  %v621_v38 = vpop.f32.mrb[3].mxu1 }
 0x112   : > { %v406_v39 = vadd.f32 %v613_v33, %v563_v30  ;;  %v414_v40 = vadd.f32 %v619_v34, %v563_v30  ;;  %v616_v41 = vadd.f32 %v615_v37, %v614_v35  ;;  %v622_v42 = vadd.f32 %v621_v38, %v620_v36 }
 0x114   : > { %v590_v43 = vpack.c.bf16 %v406_v39, %v406_v39  ;;  %v592_v44 = vpack.c.bf16 %v414_v40, %v414_v40  ;;  %v409_v45 = vadd.f32 %v616_v41, %v563_v30  ;;  %v417_v46 = vadd.f32 %v622_v42, %v563_v30 }
 0x116   : > { %437 = vst.msk [vmem:[%s206_s10] sm:$0xf] %vm436_vm0, %v590_v43  ;;  %439 = vst.msk [vmem:[%s206_s10 + $0x8] sm:$0xf] %vm436_vm0, %v592_v44  ;;  %v591_v47 = vpack.c.bf16 %v409_v45, %v409_v45  ;;  %v593_v48 = vpack.c.bf16 %v417_v46, %v417_v46 }
 0x118   : > { %438 = vst.msk [vmem:[%s206_s10 + $0x4] sm:$0xf] %vm436_vm0, %v591_v47  ;;  %440 = vst.msk [vmem:[%s206_s10 + $0xc] sm:$0xf] %vm436_vm0, %v593_v48 }
 0x119   : > { %725 = shalt.err (!%p722_p5)
}
 0x11a   : > { %s726_s28 = scalar_lea.hbm %s931_s19, 256  ;;  %s730_s4 = scalar_lea.hbm %s986_s3, 3072 }
 0x11b   : > { %p727_p6 = scmp.ne.s32.totalorder %s931_s19, %s726_s28  ;;  %p731_p10 = scmp.lt.u32.totalorder %s931_s19, %s986_s3 }
 0x11c   : > { %p732_p11 = scmp.lt.u32.totalorder %s730_s4, %s726_s28  ;;  %p734_p13 = scmp.lt.u32.totalorder %s726_s28, %s931_s19 }
 0x11d   : > { %p728_p7 = pnand %p727_p6, %p855_p4 }
 0x11e   : > { %p733_p12 = por %p732_p11, %p731_p10 }
 0x11f   : > { %p729_p9 = pneg %p728_p7 }
 0x120   : > { %p735_p0 = por %p734_p13, %p733_p12 }
 0x122   : > { %p736_p1 = pnand %p735_p0, %p729_p9 }
 0x124   : > { %739 = shalt.err (!%p736_p1)
}
 0x125   : > { %s793_s8 = smov 64   ;;  %s794_s9 = smov 4  }
 0x126   : > { %639 = dma.vmem_to_hbm [thread:$0]  (%p855_p4), %s933_s7, 256, %s931_s19, %s937_s15, %s793_s8, %s793_s8, %s794_s9  }
 0x127 PF: > { %p645_p2 = scmp.ge.s32.totalorder %s790_s17, 2  ;;  %s472_s10 = sand.u32 1, %s770_s12  }
 0x128   : > { %s473_s11 = scalar_lea.sflag [#allocation3], %s472_s10 }
 0x129   : > { %p642_p3 = pnand %p645_p2, %p862_p8 }
 0x12b   : > { %765 = dma.done.wait (!%p642_p3), %s473_s11, 256  }
 0x12c   : > { %767 = vsyncadd (!%p642_p3), %s473_s11, 4294967040  ;;  %s16_s17 = sadd.s32 1, %s790_s17   ;;  %s989_s12 = smov %s774_s13 }
 0x12d   : > { %p13_p5 = scmp.ge.s32.totalorder %s16_s17, 14   ;;  %s990_s13 = smov %s778_s14 }
 0x12e   : > { %s991_s14 = smov %s868_s25  ;;  %s992_s15 = smov %s786_s16 }
 0x12f   : > { %s993_s16 = smov %s995_s20  ;;  %15 = sbr.rel (!%p13_p5) target bundleno = 4 (0x4), region = 73 }
 0x136   :  { %478 = vsyncpa [#allocation3], 1 }
 0x137   :  { %480 = vsyncpa [#allocation3 + $0x1], 1 }

</bundles_post_ra>
